<compile_context>
chip_gen: v7x
topology: tpu7x:2x2x1
jax: 0.10.0
libtpu: 0.0.40
codegen_flags: <defaults>
</compile_context>

<pallas_src>
import functools

import jax
import jax.numpy as jnp
from jax.experimental import pallas as pl
from jax.experimental.pallas import tpu as pltpu

INPUT_SIZE = 10    # window_size
HIDDEN_SIZE = 128


def _round_up(x, m):
    return ((x + m - 1) // m) * m


def _mlp_kernel(x_ref, t_ref, w1x_ref, w1t_ref, b1_ref,
                w2_ref, b2_ref, w3_ref, b3_ref, o_ref):
    # x_ref:  [TB, INPUT_SIZE] f32     t_ref:  [TB, 1] f32
    # w1x:    [INPUT_SIZE, H]  bf16    w1t:    [1, H]  f32   b1: [1, H] f32
    # w2:     [H, H]           bf16    b2:     [1, H]  f32
    # w3:     [H, INPUT_SIZE]  bf16    b3:     [1, INPUT_SIZE] f32
    # o_ref:  [TB, INPUT_SIZE] f32
    x = x_ref[...]
    t = t_ref[...]

    # Layer 1: fused concat -> matmul over x + rank-1 time term (f32 FMA).
    h1 = jnp.dot(x.astype(jnp.bfloat16), w1x_ref[...],
                 preferred_element_type=jnp.float32)
    h1 = h1 + t * w1t_ref[...] + b1_ref[...]
    h1 = jnp.maximum(h1, 0.0)

    # Layer 2
    h2 = jnp.dot(h1.astype(jnp.bfloat16), w2_ref[...],
                 preferred_element_type=jnp.float32) + b2_ref[...]
    h2 = jnp.maximum(h2, 0.0)

    # Layer 3 (output)
    out = jnp.dot(h2.astype(jnp.bfloat16), w3_ref[...],
                  preferred_element_type=jnp.float32) + b3_ref[...]
    o_ref[...] = out.astype(o_ref.dtype)


def _forward_impl(x_t, t, params, *, block_rows=512):
    """x_t: [B, INPUT_SIZE], t: [B] (int or float). Returns [B, INPUT_SIZE] f32."""
    w1, b1, w2, b2, w3, b3 = params
    B = x_t.shape[0]

    x_f32 = x_t.astype(jnp.float32)
    t_col = t.astype(jnp.float32).reshape(B, 1)

    # Split the time row out of W1 so the concat never materializes; cast the
    # matmul weights to bf16 (MXU native), keep bias / time row in f32.
    w1x = w1[:INPUT_SIZE].astype(jnp.bfloat16)              # [INPUT_SIZE, H]
    w1t = w1[INPUT_SIZE:INPUT_SIZE + 1].astype(jnp.float32)  # [1, H]
    b1f = b1.reshape(1, HIDDEN_SIZE).astype(jnp.float32)
    w2b = w2.astype(jnp.bfloat16)
    b2f = b2.reshape(1, HIDDEN_SIZE).astype(jnp.float32)
    w3b = w3.astype(jnp.bfloat16)
    b3f = b3.reshape(1, INPUT_SIZE).astype(jnp.float32)

    # Row tile: multiple of 8, at most block_rows; pad batch to a multiple.
    TB = min(block_rows, _round_up(B, 8))
    Bp = _round_up(B, TB)
    if Bp != B:
        pad = Bp - B
        x_f32 = jnp.pad(x_f32, ((0, pad), (0, 0)))
        t_col = jnp.pad(t_col, ((0, pad), (0, 0)))

    grid = (Bp // TB,)
    const = lambda i: (0, 0)   # weights / biases: same block every grid step

    out = pl.pallas_call(
        _mlp_kernel,
        out_shape=jax.ShapeDtypeStruct((Bp, INPUT_SIZE), jnp.float32),
        grid=grid,
        in_specs=[
            pl.BlockSpec((TB, INPUT_SIZE), lambda i: (i, 0)),   # x_t rows
            pl.BlockSpec((TB, 1), lambda i: (i, 0)),            # t rows
            pl.BlockSpec((INPUT_SIZE, HIDDEN_SIZE), const),     # w1x (bf16)
            pl.BlockSpec((1, HIDDEN_SIZE), const),              # w1t (f32)
            pl.BlockSpec((1, HIDDEN_SIZE), const),              # b1
            pl.BlockSpec((HIDDEN_SIZE, HIDDEN_SIZE), const),    # w2 (bf16)
            pl.BlockSpec((1, HIDDEN_SIZE), const),              # b2
            pl.BlockSpec((HIDDEN_SIZE, INPUT_SIZE), const),     # w3 (bf16)
            pl.BlockSpec((1, INPUT_SIZE), const),               # b3
        ],
        out_specs=pl.BlockSpec((TB, INPUT_SIZE), lambda i: (i, 0)),
        compiler_params=pltpu.CompilerParams(
            dimension_semantics=("parallel",)),
    )(x_f32, t_col, w1x, w1t, b1f, w2b, b2f, w3b, b3f)

    return out[:B]


denoising_model_forward = jax.jit(_forward_impl, static_argnames=("block_rows",))


def init_params(key):
    """Deterministic init matching nn.Linear shapes (stored transposed: [in, out])."""
    k1, k2, k3, k4, k5, k6 = jax.random.split(key, 6)
    fan1 = INPUT_SIZE + 1
    fan2 = HIDDEN_SIZE
    fan3 = HIDDEN_SIZE
    lim1 = 1.0 / jnp.sqrt(fan1)
    lim2 = 1.0 / jnp.sqrt(fan2)
    lim3 = 1.0 / jnp.sqrt(fan3)
    w1 = jax.random.uniform(k1, (fan1, HIDDEN_SIZE), jnp.float32, -lim1, lim1)
    b1 = jax.random.uniform(k2, (1, HIDDEN_SIZE), jnp.float32, -lim1, lim1)
    w2 = jax.random.uniform(k3, (fan2, HIDDEN_SIZE), jnp.float32, -lim2, lim2)
    b2 = jax.random.uniform(k4, (1, HIDDEN_SIZE), jnp.float32, -lim2, lim2)
    w3 = jax.random.uniform(k5, (fan3, INPUT_SIZE), jnp.float32, -lim3, lim3)
    b3 = jax.random.uniform(k6, (1, INPUT_SIZE), jnp.float32, -lim3, lim3)
    return (w1, b1, w2, b2, w3, b3)


def reference_forward(x_t, t, params):
    """Pure-f32 reference matching the PyTorch module exactly."""
    w1, b1, w2, b2, w3, b3 = params
    x = jnp.concatenate([x_t.astype(jnp.float32),
                         t.astype(jnp.float32)[..., None]], axis=-1)
    h = jnp.maximum(x @ w1 + b1, 0.0)
    h = jnp.maximum(h @ w2 + b2, 0.0)
    return h @ w3 + b3


def _check(out, ref, tol=3e-2):
    # bf16 matmuls with f32 accumulation vs f32 reference -> normalized tolerance.
    err = jnp.max(jnp.abs(out - ref)) / (jnp.max(jnp.abs(ref)) + 1e-6)
    assert err < tol, f"mismatch vs reference: normalized max err {err}"


if __name__ == "__main__":
    key = jax.random.PRNGKey(0)
    kp, kx, kt, kx2, kt2 = jax.random.split(key, 5)

    params = init_params(kp)

    # Small batch: single tile (TB = 8), grid = (1,)
    batch = 8
    x_t = jax.random.normal(kx, (batch, INPUT_SIZE), dtype=jnp.float32)
    t = jax.random.randint(kt, (batch,), 0, 1000)  # diffusion timestep per sample

    out = denoising_model_forward(x_t, t, params)
    out = jax.block_until_ready(out)
    assert out.shape == (batch, INPUT_SIZE), out.shape
    _check(out, reference_forward(x_t, t, params))

    # Larger, non-multiple batch: exercises the tiled grid + tail padding path.
    batch2 = 1000
    x_t2 = jax.random.normal(kx2, (batch2, INPUT_SIZE), dtype=jnp.float32)
    t2 = jax.random.randint(kt2, (batch2,), 0, 1000)
    out2 = denoising_model_forward(x_t2, t2, params)
    out2 = jax.block_until_ready(out2)
    assert out2.shape == (batch2, INPUT_SIZE), out2.shape
    _check(out2, reference_forward(x_t2, t2, params))

    print("KERNEL_OK")
</pallas_src>

<mosaic_0001>
module attributes {stable_mosaic.version = 11 : i64} {
  func.func @_mlp_kernel(%arg0: i32, %arg1: memref<8x10xf32, #tpu.memory_space<vmem>>, %arg2: memref<8x1xf32, #tpu.memory_space<vmem>>, %arg3: memref<10x128xbf16, #tpu.memory_space<vmem>>, %arg4: memref<1x128xf32, #tpu.memory_space<vmem>>, %arg5: memref<1x128xf32, #tpu.memory_space<vmem>>, %arg6: memref<128x128xbf16, #tpu.memory_space<vmem>>, %arg7: memref<1x128xf32, #tpu.memory_space<vmem>>, %arg8: memref<128x10xbf16, #tpu.memory_space<vmem>>, %arg9: memref<1x10xf32, #tpu.memory_space<vmem>>, %arg10: memref<8x10xf32, #tpu.memory_space<vmem>>) attributes {dimension_semantics = [#tpu.dimension_semantics<parallel>], iteration_bounds = array<i64: 1>, scalar_prefetch = 0 : i64, scratch_operands = 0 : i64, tpu.core_type = #tpu.core_type<tc>, window_params = [{transform_indices = @transform_0, window_bounds = array<i64: 8, 10>}, {transform_indices = @transform_1, window_bounds = array<i64: 8, 1>}, {pipeline_mode = #tpu.pipeline_mode<synchronous>, transform_indices = @transform_2, window_bounds = array<i64: 10, 128>}, {pipeline_mode = #tpu.pipeline_mode<synchronous>, transform_indices = @transform_3, window_bounds = array<i64: 1, 128>}, {pipeline_mode = #tpu.pipeline_mode<synchronous>, transform_indices = @transform_4, window_bounds = array<i64: 1, 128>}, {pipeline_mode = #tpu.pipeline_mode<synchronous>, transform_indices = @transform_5, window_bounds = array<i64: 128, 128>}, {pipeline_mode = #tpu.pipeline_mode<synchronous>, transform_indices = @transform_6, window_bounds = array<i64: 1, 128>}, {pipeline_mode = #tpu.pipeline_mode<synchronous>, transform_indices = @transform_7, window_bounds = array<i64: 128, 10>}, {pipeline_mode = #tpu.pipeline_mode<synchronous>, transform_indices = @transform_8, window_bounds = array<i64: 1, 10>}, {transform_indices = @transform_9, window_bounds = array<i64: 8, 10>}]} {
    %c0 = arith.constant 0 : index
    %c0_0 = arith.constant 0 : index
    %0 = vector.load %arg1[%c0, %c0_0] : memref<8x10xf32, #tpu.memory_space<vmem>>, vector<8x10xf32>
    %c0_1 = arith.constant 0 : index
    %c0_2 = arith.constant 0 : index
    %1 = vector.load %arg2[%c0_1, %c0_2] : memref<8x1xf32, #tpu.memory_space<vmem>>, vector<8x1xf32>
    %2 = arith.truncf %0 : vector<8x10xf32> to vector<8x10xbf16>
    %c0_3 = arith.constant 0 : index
    %c0_4 = arith.constant 0 : index
    %3 = vector.load %arg3[%c0_3, %c0_4] : memref<10x128xbf16, #tpu.memory_space<vmem>>, vector<10x128xbf16>
    %cst = arith.constant dense<0.000000e+00> : vector<8x128xf32>
    %4 = tpu.matmul %2, %3, %cst {dimension_numbers = #tpu.dot_dimension_numbers<[1], [0], [0], [1], [0, 0, 1, 1], [], []>} : vector<8x10xbf16>, vector<10x128xbf16>, vector<8x128xf32> -> vector<8x128xf32>
    %c0_5 = arith.constant 0 : index
    %c0_6 = arith.constant 0 : index
    %5 = vector.load %arg4[%c0_5, %c0_6] : memref<1x128xf32, #tpu.memory_space<vmem>>, vector<1x128xf32>
    %6 = vector.broadcast %1 : vector<8x1xf32> to vector<8x128xf32>
    %7 = vector.broadcast %5 : vector<1x128xf32> to vector<8x128xf32>
    %8 = arith.mulf %6, %7 : vector<8x128xf32>
    %9 = arith.addf %4, %8 : vector<8x128xf32>
    %c0_7 = arith.constant 0 : index
    %c0_8 = arith.constant 0 : index
    %10 = vector.load %arg5[%c0_7, %c0_8] : memref<1x128xf32, #tpu.memory_space<vmem>>, vector<1x128xf32>
    %11 = vector.broadcast %10 : vector<1x128xf32> to vector<8x128xf32>
    %12 = arith.addf %9, %11 : vector<8x128xf32>
    %cst_9 = arith.constant 0.000000e+00 : f32
    %13 = vector.broadcast %cst_9 : f32 to vector<8x128xf32>
    %14 = arith.maximumf %12, %13 : vector<8x128xf32>
    %15 = arith.truncf %14 : vector<8x128xf32> to vector<8x128xbf16>
    %c0_10 = arith.constant 0 : index
    %c0_11 = arith.constant 0 : index
    %16 = vector.load %arg6[%c0_10, %c0_11] : memref<128x128xbf16, #tpu.memory_space<vmem>>, vector<128x128xbf16>
    %cst_12 = arith.constant dense<0.000000e+00> : vector<8x128xf32>
    %17 = tpu.matmul %15, %16, %cst_12 {dimension_numbers = #tpu.dot_dimension_numbers<[1], [0], [0], [1], [0, 0, 1, 1], [], []>} : vector<8x128xbf16>, vector<128x128xbf16>, vector<8x128xf32> -> vector<8x128xf32>
    %c0_13 = arith.constant 0 : index
    %c0_14 = arith.constant 0 : index
    %18 = vector.load %arg7[%c0_13, %c0_14] : memref<1x128xf32, #tpu.memory_space<vmem>>, vector<1x128xf32>
    %19 = vector.broadcast %18 : vector<1x128xf32> to vector<8x128xf32>
    %20 = arith.addf %17, %19 : vector<8x128xf32>
    %cst_15 = arith.constant 0.000000e+00 : f32
    %21 = vector.broadcast %cst_15 : f32 to vector<8x128xf32>
    %22 = arith.maximumf %20, %21 : vector<8x128xf32>
    %23 = arith.truncf %22 : vector<8x128xf32> to vector<8x128xbf16>
    %c0_16 = arith.constant 0 : index
    %c0_17 = arith.constant 0 : index
    %24 = vector.load %arg8[%c0_16, %c0_17] : memref<128x10xbf16, #tpu.memory_space<vmem>>, vector<128x10xbf16>
    %cst_18 = arith.constant dense<0.000000e+00> : vector<8x10xf32>
    %25 = tpu.matmul %23, %24, %cst_18 {dimension_numbers = #tpu.dot_dimension_numbers<[1], [0], [0], [1], [0, 0, 1, 1], [], []>} : vector<8x128xbf16>, vector<128x10xbf16>, vector<8x10xf32> -> vector<8x10xf32>
    %c0_19 = arith.constant 0 : index
    %c0_20 = arith.constant 0 : index
    %26 = vector.load %arg9[%c0_19, %c0_20] : memref<1x10xf32, #tpu.memory_space<vmem>>, vector<1x10xf32>
    %27 = vector.broadcast %26 : vector<1x10xf32> to vector<8x10xf32>
    %28 = arith.addf %25, %27 : vector<8x10xf32>
    %c0_21 = arith.constant 0 : index
    %c0_22 = arith.constant 0 : index
    %29 = vector.load %arg10[%c0_21, %c0_22] : memref<8x10xf32, #tpu.memory_space<vmem>>, vector<8x10xf32>
    tpu.vector_store %arg10[%c0_21, %c0_22], %28 {strides = array<i32>} : memref<8x10xf32, #tpu.memory_space<vmem>>, vector<8x10xf32>,
    return
  }
  func.func @transform_0(%arg0: i32) -> (i32, i32) {
    %c0_i32 = arith.constant 0 : i32
    %c0_i32_0 = arith.constant 0 : i32
    return %arg0, %c0_i32 : i32, i32
  }
  func.func @transform_1(%arg0: i32) -> (i32, i32) {
    %c0_i32 = arith.constant 0 : i32
    %c0_i32_0 = arith.constant 0 : i32
    return %arg0, %c0_i32 : i32, i32
  }
  func.func @transform_2(%arg0: i32) -> (i32, i32) {
    %c0_i32 = arith.constant 0 : i32
    %c0_i32_0 = arith.constant 0 : i32
    %c0_i32_1 = arith.constant 0 : i32
    return %c0_i32, %c0_i32_0 : i32, i32
  }
  func.func @transform_3(%arg0: i32) -> (i32, i32) {
    %c0_i32 = arith.constant 0 : i32
    %c0_i32_0 = arith.constant 0 : i32
    %c0_i32_1 = arith.constant 0 : i32
    return %c0_i32, %c0_i32_0 : i32, i32
  }
  func.func @transform_4(%arg0: i32) -> (i32, i32) {
    %c0_i32 = arith.constant 0 : i32
    %c0_i32_0 = arith.constant 0 : i32
    %c0_i32_1 = arith.constant 0 : i32
    return %c0_i32, %c0_i32_0 : i32, i32
  }
  func.func @transform_5(%arg0: i32) -> (i32, i32) {
    %c0_i32 = arith.constant 0 : i32
    %c0_i32_0 = arith.constant 0 : i32
    %c0_i32_1 = arith.constant 0 : i32
    return %c0_i32, %c0_i32_0 : i32, i32
  }
  func.func @transform_6(%arg0: i32) -> (i32, i32) {
    %c0_i32 = arith.constant 0 : i32
    %c0_i32_0 = arith.constant 0 : i32
    %c0_i32_1 = arith.constant 0 : i32
    return %c0_i32, %c0_i32_0 : i32, i32
  }
  func.func @transform_7(%arg0: i32) -> (i32, i32) {
    %c0_i32 = arith.constant 0 : i32
    %c0_i32_0 = arith.constant 0 : i32
    %c0_i32_1 = arith.constant 0 : i32
    return %c0_i32, %c0_i32_0 : i32, i32
  }
  func.func @transform_8(%arg0: i32) -> (i32, i32) {
    %c0_i32 = arith.constant 0 : i32
    %c0_i32_0 = arith.constant 0 : i32
    %c0_i32_1 = arith.constant 0 : i32
    return %c0_i32, %c0_i32_0 : i32, i32
  }
  func.func @transform_9(%arg0: i32) -> (i32, i32) {
    %c0_i32 = arith.constant 0 : i32
    %c0_i32_0 = arith.constant 0 : i32
    return %arg0, %c0_i32 : i32, i32
  }
}

</mosaic_0001>

<bundles_post_ra>
// kernel: _forward_impl.1
= control target key start
LH: loop header
LB: loop body
LE: loop exit
PB: predicated region body
PF: predicated region fallthrough
CT: control target
= control target key end

     0   :  { %vm61_vm0 = vcmask 1044480   ;;  %v488_v0 = vmov 0.0   ;;  %vm489_vm1 = vmmov 0   ;;  %v490_v3 = vmov 0   ;;  %s648_s0 = inlined_call_operand.vmem [shape: f32[8,10], index: 0, kind: input, shape index: {}]   ;;  %s649_s1 = inlined_call_operand.vmem [shape: f32[8,1], index: 1, kind: input, shape index: {}]   ;;  %s650_s2 = inlined_call_operand.vmem [shape: bf16[10,128], index: 2, kind: input, shape index: {}]   ;;  %s651_s3 = inlined_call_operand.vmem [shape: f32[1,128], index: 3, kind: input, shape index: {}]   ;;  %s652_s4 = inlined_call_operand.vmem [shape: f32[1,128], index: 4, kind: input, shape index: {}]   ;;  %s653_s5 = inlined_call_operand.vmem [shape: bf16[128,128], index: 5, kind: input, shape index: {}]   ;;  %s654_s6 = inlined_call_operand.vmem [shape: f32[1,128], index: 6, kind: input, shape index: {}]   ;;  %s655_s7 = inlined_call_operand.vmem [shape: bf16[128,10], index: 7, kind: input, shape index: {}]   ;;  %s656_s8 = inlined_call_operand.vmem [shape: f32[1,10], index: 8, kind: input, shape index: {}]   ;;  %s657_s9 = inlined_call_operand.hbm [shape: f32[8,10], index: 9, kind: output, shape index: {}]  }
   0x1   :  { %396 = vmatprep.subr.bf16.mxu0 %v488_v0  ;;  %v447_v1 = vld [vmem:[%s650_s2] sm:$0x1f]   ;;  %402 = vmatprep.subr.bf16.mxu1 %v488_v0  ;;  %vm57_vm2 = vcmask 80896   ;;  %v449_v8 = vld [vmem:[%s653_s5 + $0x8] sm:$0xff]   ;;  %v450_v9 = vld [vmem:[%s653_s5 + $0x10] sm:$0xff]  }
   0x2   :  { %v34_v2 = vld [vmem:[%s648_s0] sm:$0xff]  ;;  %398 = vmatprep.mubr.msk.bf16.mxu0 %vm489_vm1, %v488_v0  ;;  %446 = vset.pattern.permute.xlu0 %v490_v3  ;;  %v63_v5 = vsel %vm61_vm0, %v447_v1, 0  ;;  %v451_v10 = vld [vmem:[%s653_s5 + $0x18] sm:$0xff]  }
   0x3   :  { %v35_v4 = vld [vmem:[%s649_s1] sm:$0xff]  ;;  %v36_v6 = vpack.c.bf16 %v34_v2, %v34_v2  ;;  %418 = vmatprep.mubr.msk.bf16.mxu1 %vm489_vm1, %v488_v0  ;;  %397 = vmatpush3.bf16.msra.mxu0 %v63_v5 }
   0x4   :  { %42 = vperm.xlu0 %446, %v35_v4   ;;  %v448_v7 = vld [vmem:[%s653_s5] sm:$0xff]   ;;  %422 = vmatprep.subr.bf16.mxu0 %v488_v0 }
   0x5   :  { %403 = vmatpush3.bf16.msra.mxu1 %v448_v7 }
   0x6   :  { %404 = vmatprep.subr.bf16.mxu1 %v488_v0  ;;  %399 = vmatmul.mubr.msk.bf16.vlgmr.msra.gmra.mrb[0].mxu0 %vm57_vm2, %v36_v6 }
   0x7   :  { %438 = vmatprep.mubr.msk.bf16.mxu0 %vm489_vm1, %v488_v0 }
   0x9   :  { %405 = vmatpush3.bf16.msra.mxu1 %v449_v8 }
   0xa   :  { %406 = vmatprep.subr.bf16.mxu1 %v488_v0 }
   0xd   :  { %407 = vmatpush3.bf16.msra.mxu1 %v450_v9 }
   0xe   :  { %408 = vmatprep.subr.bf16.mxu1 %v488_v0 }
   0xf   :  { %14 = vsyncpa [#allocation3], 0  ;;  %v452_v11 = vld [vmem:[%s653_s5 + $0x20] sm:$0xff]   ;;  %v453_v12 = vld [vmem:[%s653_s5 + $0x28] sm:$0xff]   ;;  %s491_s25 = smov [#allocation2]  }
  0x10   :  { %v454_v13 = vld [vmem:[%s653_s5 + $0x30] sm:$0xff]   ;;  %v455_v14 = vld [vmem:[%s653_s5 + $0x38] sm:$0xff]   ;;  %v456_v15 = vld [vmem:[%s655_s7] sm:$0xff]   ;;  %s346_s26 = sshll.u32 %s491_s25, 4  ;;  %s347_s26 = int_to_ptr.vmem [resolvable:$true] %s346_s26 }
  0x11   :  { %409 = vmatpush3.bf16.msra.mxu1 %v451_v10  ;;  %423 = vmatpush3.bf16.msra.mxu0 %v456_v15  ;;  %v457_v16 = vld [vmem:[%s655_s7 + $0x8] sm:$0xff]   ;;  %v458_v17 = vld [vmem:[%s655_s7 + $0x10] sm:$0xff]   ;;  %v459_v18 = vld [vmem:[%s655_s7 + $0x18] sm:$0xff]   ;;  %p469_p1 = scmp.lt.s32.totalorder %s347_s26, %s347_s26 }
  0x12   :  { %410 = vmatprep.subr.bf16.mxu1 %v488_v0  ;;  %424 = vmatprep.subr.bf16.mxu0 %v488_v0  ;;  %v460_v19 = vld [vmem:[%s655_s7 + $0x20] sm:$0xff]   ;;  %v461_v20 = vld [vmem:[%s655_s7 + $0x28] sm:$0xff]   ;;  %v462_v33 = vld [vmem:[%s655_s7 + $0x30] sm:$0xff]  }
  0x13   :  { %v354_v21 = vld [vmem:[%s651_s3] ss:$0 sm:$0xff]  ;;  %v463_v34 = vld [vmem:[%s655_s7 + $0x38] sm:$0xff]  }
  0x14   :  { %v357_v25 = vld [vmem:[%s652_s4] ss:$0 sm:$0xff] }
  0x15   :  { %411 = vmatpush3.bf16.msra.mxu1 %v452_v11  ;;  %425 = vmatpush3.bf16.msra.mxu0 %v457_v16  ;;  %v358_v35 = vld [vmem:[%s654_s6] ss:$0 sm:$0xff]  ;;  %s464_s6 = scalar_lea.vmem %s347_s26, 128 }
  0x16   :  { %412 = vmatprep.subr.bf16.mxu1 %v488_v0  ;;  %426 = vmatprep.subr.bf16.mxu0 %v488_v0  ;;  %v367_v43 = vld [vmem:[%s656_s8] ss:$0 sm:$0xff]  ;;  %p465_p0 = scmp.ne.s32.totalorder %s347_s26, %s464_s6  ;;  %p470_p2 = scmp.lt.s32.totalorder %s464_s6, %s464_s6 }
  0x18   :  { %p471_p3 = por %p470_p2, %p469_p1 }
  0x19   :  { %413 = vmatpush3.bf16.msra.mxu1 %v453_v12  ;;  %427 = vmatpush3.bf16.msra.mxu0 %v458_v17 }
  0x1a   :  { %414 = vmatprep.subr.bf16.mxu1 %v488_v0  ;;  %428 = vmatprep.subr.bf16.mxu0 %v488_v0  ;;  %p472_p4 = pnand %p471_p3, %p465_p0 }
  0x1d   :  { %415 = vmatpush3.bf16.msra.mxu1 %v454_v13  ;;  %429 = vmatpush3.bf16.msra.mxu0 %v459_v18 }
  0x1e   :  { %416 = vmatprep.subr.bf16.mxu1 %v488_v0  ;;  %430 = vmatprep.subr.bf16.mxu0 %v488_v0 }
  0x21   :  { %417 = vmatpush3.bf16.msra.mxu1 %v455_v14  ;;  %431 = vmatpush3.bf16.msra.mxu0 %v460_v19 }
  0x22   :  { %432 = vmatprep.subr.bf16.mxu0 %v488_v0 }
  0x25   :  { %433 = vmatpush3.bf16.msra.mxu0 %v461_v20 }
  0x26   :  { %434 = vmatprep.subr.bf16.mxu0 %v488_v0 }
  0x29   :  { %435 = vmatpush3.bf16.msra.mxu0 %v462_v33 }
  0x2a   :  { %436 = vmatprep.subr.bf16.mxu0 %v488_v0 }
  0x2d   :  { %437 = vmatpush3.bf16.msra.mxu0 %v463_v34 }
  0x83   :  { %v43_v22 = vpop.permute.xlu0 %42 }
  0x84   :  { %v51_v23 = vmul.f32 %v354_v21, %v43_v22 }
  0xd9   :  { %v99_v24 = vpop.f32.mrb[0].mxu0 }
  0xda   :  { %v100_v26 = vadd.f32 %v99_v24, %v51_v23  ;;  %v400_v27 = vpop.f32.mrb[1].mxu0 }
  0xdb   :  { %v102_v28 = vpop.f32.mrb[2].mxu0 }
  0xdc   :  { %v112_v29 = vadd.f32 %v357_v25, %v100_v26  ;;  %v401_v30 = vpop.f32.mrb[3].mxu0 }
  0xde   :  { %v113_v31 = vmax.f32 %v112_v29, 0.0 }
  0xe0   :  { %v114_v32 = vpack.c.bf16 %v113_v31, %v113_v31 }
  0xe2   :  { %419 = vmatmul.mubr.bf16.vlgmr.msra.gmra.mrb[0].mxu1 %v114_v32 }
 0x1b5   :  { %v220_v36 = vpop.f32.mrb[0].mxu1 }
 0x1b6   :  { %v221_v37 = vadd.f32 %v358_v35, %v220_v36  ;;  %v420_v38 = vpop.f32.mrb[1].mxu1 }
 0x1b7   :  { %v223_v39 = vpop.f32.mrb[2].mxu1 }
 0x1b8   :  { %v226_v40 = vmax.f32 %v221_v37, 0.0  ;;  %v421_v41 = vpop.f32.mrb[3].mxu1 }
 0x1ba   :  { %v227_v42 = vpack.c.bf16 %v226_v40, %v226_v40 }
 0x1bc   :  { %439 = vmatmul.mubr.bf16.vlgmr.msra.gmra.mrb[4].mxu0 %v227_v42 }
 0x28f   :  { %v333_v44 = vpop.f32.mrb[4].mxu0 }
 0x290   :  { %v334_v45 = vadd.f32 %v367_v43, %v333_v44  ;;  %v440_v46 = vpop.f32.mrb[5].mxu0 }
 0x291   :  { %v336_v47 = vpop.f32.mrb[6].mxu0 }
 0x292   :  { %339 = vst.msk [vmem:[#allocation2] sm:$0xff] %vm57_vm2, %v334_v45  ;;  %v441_v48 = vpop.f32.mrb[7].mxu0 }
 0x293   :  { %475 = shalt.err (!%p472_p4)
}
 0x294   :  { %s476_s8 = scalar_lea.hbm %s657_s9, 128 }
 0x295   :  { %p477_p5 = scmp.ne.s32.totalorder %s657_s9, %s476_s8  ;;  %p480_p6 = scmp.lt.u32.totalorder %s476_s8, %s657_s9 }
 0x297   :  { %p482_p7 = pnand %p480_p6, %p477_p5 }
 0x299   :  { %485 = shalt.err (!%p482_p7)
}
 0x29a   :  { %349 = dma.vmem_to_hbm [thread:$0]  %s347_s26, 128, %s657_s9, [#allocation3]  }
 0x29b   :  { %486 = dma.done.wait [#allocation3], 128  }
 0x29c   :  { %487 = vsyncadd [#allocation3], 4294967168 }
 0x29d   :  { %353 = vsyncpa [#allocation3], 1 }

</bundles_post_ra>
